<compile_context>
chip_gen: v6e
topology: v6e:2x2x1
jax: 0.10.0
libtpu: 0.0.40
codegen_flags: <defaults>
</compile_context>

<pallas_src>
import numpy as np

import jax
import jax.numpy as jnp
from jax.experimental import pallas as pl
from jax.experimental.pallas import tpu as pltpu

BN_EPS = 1e-5
SMALL_BATCH_MAX = 128   # <= this: one grid step (weight-stream / launch bound)
MAX_ROW_TILE = 1024     # cap on rows per grid step (activation tiles stay tiny)


def conv2d_size_out(size, kernel_size, stride):
    return (size - (kernel_size - 1) - 1) // stride + 1


def _round_up(x, m):
    return ((x + m - 1) // m) * m


# ----------------------------------------------------------------------------
# Host-side, one-time parameter folding
# ----------------------------------------------------------------------------
def _fold_bn(conv_b, gamma, beta, mean, var, eps=BN_EPS):
    scale = np.asarray(gamma, np.float32) / np.sqrt(np.asarray(var, np.float32) + eps)
    bias = (np.asarray(conv_b, np.float32) - np.asarray(mean, np.float32)) * scale \
        + np.asarray(beta, np.float32)
    return scale, bias


def _conv_bn_to_matrix(w, b, gamma, beta, mean, var, H, W, stride,
                       input_layout="NCHW", eps=BN_EPS):
    """Fold Conv2d(no pad) + eval BatchNorm into a dense matrix on the
    flattened input activations.

    input_layout selects the flat row order of the INPUT activations:
      'NCHW': c*H*W + h*W + w     (PyTorch default flatten)
      'NHWC': (h*W + w)*C + c     (matches the wrapper im2col conv1 output)
    Output columns are always NCHW-flat: oc*OH*OW + oh*OW + ow, so the chain
    conv2 -> conv3 -> fc1 matches torch's x.view(B, -1).
    """
    w = np.asarray(w, np.float32)
    OC, C, KH, KW = w.shape
    OH = conv2d_size_out(H, KH, stride)
    OW = conv2d_size_out(W, KW, stride)
    scale, bias_eff = _fold_bn(b, gamma, beta, mean, var, eps)

    shape = (OC, OH, OW, C, KH, KW)
    oc = np.arange(OC).reshape(OC, 1, 1, 1, 1, 1)
    oh = np.arange(OH).reshape(1, OH, 1, 1, 1, 1)
    ow = np.arange(OW).reshape(1, 1, OW, 1, 1, 1)
    c = np.arange(C).reshape(1, 1, 1, C, 1, 1)
    kh = np.arange(KH).reshape(1, 1, 1, 1, KH, 1)
    kw = np.arange(KW).reshape(1, 1, 1, 1, 1, KW)

    h_in = oh * stride + kh
    w_in = ow * stride + kw
    if input_layout == "NCHW":
        rows = c * H * W + h_in * W + w_in
    elif input_layout == "NHWC":
        rows = (h_in * W + w_in) * C + c
    else:
        raise ValueError(input_layout)
    rows = np.broadcast_to(rows, shape)
    cols = np.broadcast_to(oc * OH * OW + oh * OW + ow, shape)
    vals = np.broadcast_to(w[oc, c, kh, kw] * scale[oc], shape)

    M = np.zeros((C * H * W, OC * OH * OW), np.float32)
    M[rows.ravel(), cols.ravel()] = vals.ravel()
    bias_vec = np.repeat(bias_eff, OH * OW).astype(np.float32)
    return M, bias_vec, OH, OW


def prepare_folded_params(params, input_dim, weight_dtype=jnp.bfloat16):
    """One-time fold:
      * conv1 + BN1 -> tiny im2col GEMM weights (used in the JAX wrapper;
        removes the 3.2 MB dense conv1 matrix from the kernel weight stream).
      * conv2/conv3 + BN -> dense bf16 matrices on the flat activation vector.
      * fc1 split into a "flat" part (bf16) and a rank-1 theta row (f32, VPU).
    All bias / VPU operands stay f32 (v5e has no bf16 VALU)."""
    width, height, channel = input_dim
    H, W = height, width  # gridmap is NCHW: (B, channel, height, width)
    folded = {}

    # --- conv1: small im2col GEMM (wrapper-side); rows ordered c*9 + kh*3 + kw
    w1 = np.asarray(params["conv1_w"], np.float32)            # (16, C, 3, 3)
    scale1, bias1 = _fold_bn(params["conv1_b"], params["bn1_gamma"],
                             params["bn1_beta"], params["bn1_mean"],
                             params["bn1_var"])
    w1 = w1 * scale1[:, None, None, None]
    OC1 = w1.shape[0]
    folded["w_c1"] = jnp.asarray(w1.transpose(1, 2, 3, 0).reshape(-1, OC1))
    folded["b_c1"] = jnp.asarray(bias1)
    H1, W1_ = conv2d_size_out(H, 3, 2), conv2d_size_out(W, 3, 2)

    # --- conv2: input is the NHWC-flat conv1 output, output NCHW-flat ---
    M2, cb2, H2, W2 = _conv_bn_to_matrix(
        params["conv2_w"], params["conv2_b"], params["bn2_gamma"],
        params["bn2_beta"], params["bn2_mean"], params["bn2_var"],
        H1, W1_, stride=2, input_layout="NHWC")
    # --- conv3: NCHW in / NCHW out ---
    M3, cb3, _, _ = _conv_bn_to_matrix(
        params["conv3_w"], params["conv3_b"], params["bn3_gamma"],
        params["bn3_beta"], params["bn3_mean"], params["bn3_var"],
        H2, W2, stride=2, input_layout="NCHW")

    folded["m2"] = jnp.asarray(M2, weight_dtype)
    folded["cb2"] = jnp.asarray(cb2, jnp.float32).reshape(1, -1)
    folded["m3"] = jnp.asarray(M3, weight_dtype)
    folded["cb3"] = jnp.asarray(cb3, jnp.float32).reshape(1, -1)

    flat = M3.shape[1]  # conv3 output, NCHW-flat (matches torch x.view(B,-1))
    fc1_w = np.asarray(params["fc1_w"], np.float32)
    assert fc1_w.shape[0] == flat + 1
    folded["w1a"] = jnp.asarray(fc1_w[:flat, :], weight_dtype)           # conv feats
    folded["w1b"] = jnp.asarray(fc1_w[flat:flat + 1, :], jnp.float32)    # theta row
    folded["b1"] = jnp.asarray(params["fc1_b"], jnp.float32).reshape(1, -1)
    folded["w2"] = jnp.asarray(params["fc2_w"], weight_dtype)
    folded["b2"] = jnp.asarray(params["fc2_b"], jnp.float32).reshape(1, -1)
    folded["w3"] = jnp.asarray(params["fc3_w"], weight_dtype)
    folded["b3"] = jnp.asarray(params["fc3_b"], jnp.float32).reshape(1, -1)
    return folded


# ----------------------------------------------------------------------------
# Wrapper-side conv1: im2col (pure layout, strided slices) + 2.3 KB GEMM
# ----------------------------------------------------------------------------
def _conv1_im2col(gridmap):
    """3x3 / stride-2 patch extraction: [B, C, H, W] -> [B, OH*OW, C*9]."""
    B, C, H, W = gridmap.shape
    OH, OW = conv2d_size_out(H, 3, 2), conv2d_size_out(W, 3, 2)
    taps = []
    for kh in range(3):
        for kw in range(3):
            taps.append(jax.lax.slice(
                gridmap, (0, 0, kh, kw),
                (B, C, kh + 2 * (OH - 1) + 1, kw + 2 * (OW - 1) + 1),
                (1, 1, 2, 2)))                     # [B, C, OH, OW]
    p = jnp.stack(taps, axis=2)                    # [B, C, 9, OH, OW]
    p = p.transpose(0, 3, 4, 1, 2)                 # [B, OH, OW, C, 9]
    return p.reshape(B, OH * OW, C * 9)            # feature = c*9 + kh*3 + kw


# ----------------------------------------------------------------------------
# Fused Pallas kernel: conv2, conv3 (folded matmuls) + fc1..fc3, one row tile
# ----------------------------------------------------------------------------
def _critic_fused_kernel(x_ref, th_ref,
                         m2_ref, cb2_ref, m3_ref, cb3_ref,
                         w1a_ref, w1b_ref, b1_ref, w2_ref, b2_ref, w3_ref, b3_ref,
                         o_ref):
    f32 = jnp.float32
    wdt = m2_ref.dtype  # bf16: MXU operand dtype

    h = x_ref[...]                                                   # [tb, 784] bf16
    # conv2 (+ folded eval-BN) + ReLU
    h = jnp.dot(h, m2_ref[...], preferred_element_type=f32) + cb2_ref[...]
    h = jnp.maximum(h, 0.0).astype(wdt)
    # conv3 (+ folded eval-BN) + ReLU
    h = jnp.dot(h, m3_ref[...], preferred_element_type=f32) + cb3_ref[...]
    h = jnp.maximum(h, 0.0).astype(wdt)
    # fc1: concat([flat, theta]) @ W == flat @ W[:flat] + theta * W[flat]
    h = (jnp.dot(h, w1a_ref[...], preferred_element_type=f32)
         + th_ref[...] * w1b_ref[...] + b1_ref[...])
    h = jnp.maximum(h, 0.0).astype(wdt)
    # fc2 + ReLU
    h = jnp.dot(h, w2_ref[...], preferred_element_type=f32) + b2_ref[...]
    h = jnp.maximum(h, 0.0).astype(wdt)
    # fc3
    h = jnp.dot(h, w3_ref[...], preferred_element_type=f32) + b3_ref[...]
    o_ref[...] = h.astype(o_ref.dtype)


def critic_forward(folded, gridmap, theta):
    """gridmap: [B, C, H, W] (NCHW), theta: [B, 1] -> [B, output_dim]."""
    B = gridmap.shape[0]
    gridmap = gridmap.astype(jnp.float32)
    theta = theta.astype(jnp.float32)

    # conv1 (+ folded BN) + ReLU: tiny im2col GEMM in the wrapper (perf review:
    # removes the 3.2 MB / 96%-zero dense conv1 matrix from the per-call HBM
    # weight stream; the GEMM itself is ~2.3 KB of weights / ~0.1 MFLOP).
    patches = _conv1_im2col(gridmap)                              # [B, 49, C*9]
    h1 = jnp.einsum("bpk,ko->bpo", patches, folded["w_c1"],
                    precision=jax.lax.Precision.HIGHEST) + folded["b_c1"]
    h1 = jnp.maximum(h1, 0.0)
    x1 = h1.reshape(B, -1).astype(jnp.bfloat16)   # NHWC-flat [B, 784], MXU feed

    K1 = x1.shape[1]
    out_dim = folded["w3"].shape[1]

    # Row tiling: single program for small B (weight-stream bound, splitting
    # would duplicate the weight fetch per TC); >=2 row tiles (multiples of 16
    # rows, capped at MAX_ROW_TILE) for large B so the "parallel" grid axis
    # shards across v7x's two TensorCores.
    if B <= SMALL_BATCH_MAX:
        tb = B
    else:
        tb = min(MAX_ROW_TILE, _round_up(-(-B // 2), 16))
    grid = (pl.cdiv(B, tb),)

    def row_spec(n):
        return pl.BlockSpec((tb, n), lambda i: (i, 0))

    def const_spec(a):
        # Grid-invariant weights: single-buffered (double-buffering a constant
        # block only wastes VMEM).
        return pl.BlockSpec(a.shape, lambda i: (0, 0),
                            pipeline_mode=pl.Buffered(1))

    weight_names = ("m2", "cb2", "m3", "cb3",
                    "w1a", "w1b", "b1", "w2", "b2", "w3", "b3")
    weights = [folded[k] for k in weight_names]

    mm_weights = [folded["m2"], folded["m3"], folded["w1a"], folded["w2"], folded["w3"]]
    flops = 2 * B * sum(int(w.shape[0]) * int(w.shape[1]) for w in mm_weights)
    weight_bytes = sum(int(np.prod(a.shape)) * a.dtype.itemsize for a in weights)
    cost = pl.CostEstimate(
        flops=int(flops),
        transcendentals=0,
        bytes_accessed=int(weight_bytes + B * (K1 * x1.dtype.itemsize
                                               + 4 + out_dim * 4)))

    return pl.pallas_call(
        _critic_fused_kernel,
        out_shape=jax.ShapeDtypeStruct((B, out_dim), jnp.float32),
        grid=grid,
        in_specs=[row_spec(K1), row_spec(1)] + [const_spec(a) for a in weights],
        out_specs=row_spec(out_dim),
        compiler_params=pltpu.CompilerParams(
            dimension_semantics=("parallel",),
            vmem_limit_bytes=32 * 1024 * 1024),
        cost_estimate=cost,
    )(x1, theta, *weights)


# ----------------------------------------------------------------------------
# Deterministic parameter init (fc weights stored as [in, out])
# ----------------------------------------------------------------------------
def init_critic_params(key, input_dim, output_dim):
    width, height, channel = input_dim
    conv_defs = [(channel, 16), (16, 32), (32, 32)]
    params = {}
    for idx, (cin, cout) in enumerate(conv_defs, start=1):
        key, k1, k2, k3, k4, k5, k6 = jax.random.split(key, 7)
        params[f"conv{idx}_w"] = 0.1 * jax.random.normal(k1, (cout, cin, 3, 3), jnp.float32)
        params[f"conv{idx}_b"] = 0.1 * jax.random.normal(k2, (cout,), jnp.float32)
        params[f"bn{idx}_gamma"] = 1.0 + 0.1 * jax.random.normal(k3, (cout,), jnp.float32)
        params[f"bn{idx}_beta"] = 0.1 * jax.random.normal(k4, (cout,), jnp.float32)
        params[f"bn{idx}_mean"] = 0.1 * jax.random.normal(k5, (cout,), jnp.float32)
        params[f"bn{idx}_var"] = jax.random.uniform(k6, (cout,), jnp.float32, 0.5, 1.5)

    w, h = width, height
    for _ in range(3):
        w = conv2d_size_out(w, 3, 2)
        h = conv2d_size_out(h, 3, 2)
    linear_input_size = w * h * 32 + 1

    fc_defs = [(linear_input_size, 64), (64, 64), (64, output_dim)]
    for idx, (fin, fout) in enumerate(fc_defs, start=1):
        key, k1, k2 = jax.random.split(key, 3)
        params[f"fc{idx}_w"] = 0.1 * jax.random.normal(k1, (fin, fout), jnp.float32)
        params[f"fc{idx}_b"] = 0.1 * jax.random.normal(k2, (fout,), jnp.float32)
    return params


# ----------------------------------------------------------------------------
# Pure-JAX reference (eval-mode BN) for a correctness self-check
# ----------------------------------------------------------------------------
def critic_forward_reference(params, gridmap, theta, eps=BN_EPS):
    hi = jax.lax.Precision.HIGHEST
    x = gridmap
    for i in range(1, 4):
        x = jax.lax.conv_general_dilated(
            x, params[f"conv{i}_w"], window_strides=(2, 2), padding="VALID",
            dimension_numbers=("NCHW", "OIHW", "NCHW"), precision=hi)
        x = x + params[f"conv{i}_b"][None, :, None, None]
        mean = params[f"bn{i}_mean"][None, :, None, None]
        var = params[f"bn{i}_var"][None, :, None, None]
        gamma = params[f"bn{i}_gamma"][None, :, None, None]
        beta = params[f"bn{i}_beta"][None, :, None, None]
        x = (x - mean) / jnp.sqrt(var + eps) * gamma + beta
        x = jnp.maximum(x, 0.0)
    x = x.reshape(x.shape[0], -1)
    x = jnp.concatenate([x, theta], axis=1)
    x = jnp.maximum(jnp.dot(x, params["fc1_w"], precision=hi) + params["fc1_b"], 0.0)
    x = jnp.maximum(jnp.dot(x, params["fc2_w"], precision=hi) + params["fc2_b"], 0.0)
    return jnp.dot(x, params["fc3_w"], precision=hi) + params["fc3_b"]


if __name__ == "__main__":
    key = jax.random.PRNGKey(0)
    B = 2
    input_dim = (16, 16, 4)  # (width, height, channel)
    output_dim = 5

    kp, kg, kt = jax.random.split(key, 3)
    params = init_critic_params(kp, input_dim, output_dim)
    folded = prepare_folded_params(params, input_dim)

    gridmap = jax.random.normal(kg, (B, input_dim[2], input_dim[1], input_dim[0]),
                                jnp.float32)  # NCHW
    theta = jax.random.normal(kt, (B, 1), jnp.float32)

    fwd = jax.jit(critic_forward)
    out = jax.block_until_ready(fwd(folded, gridmap, theta))
    assert out.shape == (B, output_dim)

    ref = jax.block_until_ready(critic_forward_reference(params, gridmap, theta))
    max_err = float(jnp.max(jnp.abs(out - ref)))
    # bf16 MXU operands across 4 chained matmuls (f32 accumulate / bias / ReLU)
    # -> typical max abs error ~1e-2 on O(1) outputs.
    assert max_err < 1e-1, f"mismatch vs plain-JAX reference: max_err={max_err}"

    print("KERNEL_OK")
</pallas_src>

<mosaic_0001>
module attributes {stable_mosaic.version = 11 : i64} {
  func.func @_critic_fused_kernel(%arg0: i32, %arg1: memref<2x784xbf16, #tpu.memory_space<vmem>>, %arg2: memref<2x1xf32, #tpu.memory_space<vmem>>, %arg3: memref<784x288xbf16, #tpu.memory_space<vmem>>, %arg4: memref<1x288xf32, #tpu.memory_space<vmem>>, %arg5: memref<288x32xbf16, #tpu.memory_space<vmem>>, %arg6: memref<1x32xf32, #tpu.memory_space<vmem>>, %arg7: memref<32x64xbf16, #tpu.memory_space<vmem>>, %arg8: memref<1x64xf32, #tpu.memory_space<vmem>>, %arg9: memref<1x64xf32, #tpu.memory_space<vmem>>, %arg10: memref<64x64xbf16, #tpu.memory_space<vmem>>, %arg11: memref<1x64xf32, #tpu.memory_space<vmem>>, %arg12: memref<64x5xbf16, #tpu.memory_space<vmem>>, %arg13: memref<1x5xf32, #tpu.memory_space<vmem>>, %arg14: memref<2x5xf32, #tpu.memory_space<vmem>>) attributes {dimension_semantics = [#tpu.dimension_semantics<parallel>], iteration_bounds = array<i64: 1>, scalar_prefetch = 0 : i64, scratch_operands = 0 : i64, tpu.core_type = #tpu.core_type<tc>, window_params = [{transform_indices = @transform_0, window_bounds = array<i64: 2, 784>}, {transform_indices = @transform_1, window_bounds = array<i64: 2, 1>}, {pipeline_mode = #tpu.pipeline_mode<synchronous>, transform_indices = @transform_2, window_bounds = array<i64: 784, 288>}, {pipeline_mode = #tpu.pipeline_mode<synchronous>, transform_indices = @transform_3, window_bounds = array<i64: 1, 288>}, {pipeline_mode = #tpu.pipeline_mode<synchronous>, transform_indices = @transform_4, window_bounds = array<i64: 288, 32>}, {pipeline_mode = #tpu.pipeline_mode<synchronous>, transform_indices = @transform_5, window_bounds = array<i64: 1, 32>}, {pipeline_mode = #tpu.pipeline_mode<synchronous>, transform_indices = @transform_6, window_bounds = array<i64: 32, 64>}, {pipeline_mode = #tpu.pipeline_mode<synchronous>, transform_indices = @transform_7, window_bounds = array<i64: 1, 64>}, {pipeline_mode = #tpu.pipeline_mode<synchronous>, transform_indices = @transform_8, window_bounds = array<i64: 1, 64>}, {pipeline_mode = #tpu.pipeline_mode<synchronous>, transform_indices = @transform_9, window_bounds = array<i64: 64, 64>}, {pipeline_mode = #tpu.pipeline_mode<synchronous>, transform_indices = @transform_10, window_bounds = array<i64: 1, 64>}, {pipeline_mode = #tpu.pipeline_mode<synchronous>, transform_indices = @transform_11, window_bounds = array<i64: 64, 5>}, {pipeline_mode = #tpu.pipeline_mode<synchronous>, transform_indices = @transform_12, window_bounds = array<i64: 1, 5>}, {transform_indices = @transform_13, window_bounds = array<i64: 2, 5>}]} {
    %c0 = arith.constant 0 : index
    %c0_0 = arith.constant 0 : index
    %0 = vector.load %arg1[%c0, %c0_0] : memref<2x784xbf16, #tpu.memory_space<vmem>>, vector<2x784xbf16>
    %c0_1 = arith.constant 0 : index
    %c0_2 = arith.constant 0 : index
    %1 = vector.load %arg3[%c0_1, %c0_2] : memref<784x288xbf16, #tpu.memory_space<vmem>>, vector<784x288xbf16>
    %cst = arith.constant dense<0.000000e+00> : vector<2x288xf32>
    %2 = tpu.matmul %0, %1, %cst {dimension_numbers = #tpu.dot_dimension_numbers<[1], [0], [0], [1], [0, 0, 1, 1], [], []>} : vector<2x784xbf16>, vector<784x288xbf16>, vector<2x288xf32> -> vector<2x288xf32>
    %c0_3 = arith.constant 0 : index
    %c0_4 = arith.constant 0 : index
    %3 = vector.load %arg4[%c0_3, %c0_4] : memref<1x288xf32, #tpu.memory_space<vmem>>, vector<1x288xf32>
    %4 = vector.broadcast %3 : vector<1x288xf32> to vector<2x288xf32>
    %5 = arith.addf %2, %4 : vector<2x288xf32>
    %cst_5 = arith.constant 0.000000e+00 : f32
    %6 = vector.broadcast %cst_5 : f32 to vector<2x288xf32>
    %7 = arith.maximumf %5, %6 : vector<2x288xf32>
    %8 = arith.truncf %7 : vector<2x288xf32> to vector<2x288xbf16>
    %c0_6 = arith.constant 0 : index
    %c0_7 = arith.constant 0 : index
    %9 = vector.load %arg5[%c0_6, %c0_7] : memref<288x32xbf16, #tpu.memory_space<vmem>>, vector<288x32xbf16>
    %cst_8 = arith.constant dense<0.000000e+00> : vector<2x32xf32>
    %10 = tpu.matmul %8, %9, %cst_8 {dimension_numbers = #tpu.dot_dimension_numbers<[1], [0], [0], [1], [0, 0, 1, 1], [], []>} : vector<2x288xbf16>, vector<288x32xbf16>, vector<2x32xf32> -> vector<2x32xf32>
    %c0_9 = arith.constant 0 : index
    %c0_10 = arith.constant 0 : index
    %11 = vector.load %arg6[%c0_9, %c0_10] : memref<1x32xf32, #tpu.memory_space<vmem>>, vector<1x32xf32>
    %12 = vector.broadcast %11 : vector<1x32xf32> to vector<2x32xf32>
    %13 = arith.addf %10, %12 : vector<2x32xf32>
    %cst_11 = arith.constant 0.000000e+00 : f32
    %14 = vector.broadcast %cst_11 : f32 to vector<2x32xf32>
    %15 = arith.maximumf %13, %14 : vector<2x32xf32>
    %16 = arith.truncf %15 : vector<2x32xf32> to vector<2x32xbf16>
    %c0_12 = arith.constant 0 : index
    %c0_13 = arith.constant 0 : index
    %17 = vector.load %arg7[%c0_12, %c0_13] : memref<32x64xbf16, #tpu.memory_space<vmem>>, vector<32x64xbf16>
    %cst_14 = arith.constant dense<0.000000e+00> : vector<2x64xf32>
    %18 = tpu.matmul %16, %17, %cst_14 {dimension_numbers = #tpu.dot_dimension_numbers<[1], [0], [0], [1], [0, 0, 1, 1], [], []>} : vector<2x32xbf16>, vector<32x64xbf16>, vector<2x64xf32> -> vector<2x64xf32>
    %c0_15 = arith.constant 0 : index
    %c0_16 = arith.constant 0 : index
    %19 = vector.load %arg2[%c0_15, %c0_16] : memref<2x1xf32, #tpu.memory_space<vmem>>, vector<2x1xf32>
    %c0_17 = arith.constant 0 : index
    %c0_18 = arith.constant 0 : index
    %20 = vector.load %arg8[%c0_17, %c0_18] : memref<1x64xf32, #tpu.memory_space<vmem>>, vector<1x64xf32>
    %21 = vector.broadcast %19 : vector<2x1xf32> to vector<2x64xf32>
    %22 = vector.broadcast %20 : vector<1x64xf32> to vector<2x64xf32>
    %23 = arith.mulf %21, %22 : vector<2x64xf32>
    %24 = arith.addf %18, %23 : vector<2x64xf32>
    %c0_19 = arith.constant 0 : index
    %c0_20 = arith.constant 0 : index
    %25 = vector.load %arg9[%c0_19, %c0_20] : memref<1x64xf32, #tpu.memory_space<vmem>>, vector<1x64xf32>
    %26 = vector.broadcast %25 : vector<1x64xf32> to vector<2x64xf32>
    %27 = arith.addf %24, %26 : vector<2x64xf32>
    %cst_21 = arith.constant 0.000000e+00 : f32
    %28 = vector.broadcast %cst_21 : f32 to vector<2x64xf32>
    %29 = arith.maximumf %27, %28 : vector<2x64xf32>
    %30 = arith.truncf %29 : vector<2x64xf32> to vector<2x64xbf16>
    %c0_22 = arith.constant 0 : index
    %c0_23 = arith.constant 0 : index
    %31 = vector.load %arg10[%c0_22, %c0_23] : memref<64x64xbf16, #tpu.memory_space<vmem>>, vector<64x64xbf16>
    %cst_24 = arith.constant dense<0.000000e+00> : vector<2x64xf32>
    %32 = tpu.matmul %30, %31, %cst_24 {dimension_numbers = #tpu.dot_dimension_numbers<[1], [0], [0], [1], [0, 0, 1, 1], [], []>} : vector<2x64xbf16>, vector<64x64xbf16>, vector<2x64xf32> -> vector<2x64xf32>
    %c0_25 = arith.constant 0 : index
    %c0_26 = arith.constant 0 : index
    %33 = vector.load %arg11[%c0_25, %c0_26] : memref<1x64xf32, #tpu.memory_space<vmem>>, vector<1x64xf32>
    %34 = vector.broadcast %33 : vector<1x64xf32> to vector<2x64xf32>
    %35 = arith.addf %32, %34 : vector<2x64xf32>
    %cst_27 = arith.constant 0.000000e+00 : f32
    %36 = vector.broadcast %cst_27 : f32 to vector<2x64xf32>
    %37 = arith.maximumf %35, %36 : vector<2x64xf32>
    %38 = arith.truncf %37 : vector<2x64xf32> to vector<2x64xbf16>
    %c0_28 = arith.constant 0 : index
    %c0_29 = arith.constant 0 : index
    %39 = vector.load %arg12[%c0_28, %c0_29] : memref<64x5xbf16, #tpu.memory_space<vmem>>, vector<64x5xbf16>
    %cst_30 = arith.constant dense<0.000000e+00> : vector<2x5xf32>
    %40 = tpu.matmul %38, %39, %cst_30 {dimension_numbers = #tpu.dot_dimension_numbers<[1], [0], [0], [1], [0, 0, 1, 1], [], []>} : vector<2x64xbf16>, vector<64x5xbf16>, vector<2x5xf32> -> vector<2x5xf32>
    %c0_31 = arith.constant 0 : index
    %c0_32 = arith.constant 0 : index
    %41 = vector.load %arg13[%c0_31, %c0_32] : memref<1x5xf32, #tpu.memory_space<vmem>>, vector<1x5xf32>
    %42 = vector.broadcast %41 : vector<1x5xf32> to vector<2x5xf32>
    %43 = arith.addf %40, %42 : vector<2x5xf32>
    %c0_33 = arith.constant 0 : index
    %c0_34 = arith.constant 0 : index
    %44 = vector.load %arg14[%c0_33, %c0_34] : memref<2x5xf32, #tpu.memory_space<vmem>>, vector<2x5xf32>
    tpu.vector_store %arg14[%c0_33, %c0_34], %43 {strides = array<i32>} : memref<2x5xf32, #tpu.memory_space<vmem>>, vector<2x5xf32>,
    return
  }
  func.func @transform_0(%arg0: i32) -> (i32, i32) {
    %c0_i32 = arith.constant 0 : i32
    %c0_i32_0 = arith.constant 0 : i32
    return %arg0, %c0_i32 : i32, i32
  }
  func.func @transform_1(%arg0: i32) -> (i32, i32) {
    %c0_i32 = arith.constant 0 : i32
    %c0_i32_0 = arith.constant 0 : i32
    return %arg0, %c0_i32 : i32, i32
  }
  func.func @transform_2(%arg0: i32) -> (i32, i32) {
    %c0_i32 = arith.constant 0 : i32
    %c0_i32_0 = arith.constant 0 : i32
    %c0_i32_1 = arith.constant 0 : i32
    return %c0_i32, %c0_i32_0 : i32, i32
  }
  func.func @transform_3(%arg0: i32) -> (i32, i32) {
    %c0_i32 = arith.constant 0 : i32
    %c0_i32_0 = arith.constant 0 : i32
    %c0_i32_1 = arith.constant 0 : i32
    return %c0_i32, %c0_i32_0 : i32, i32
  }
  func.func @transform_4(%arg0: i32) -> (i32, i32) {
    %c0_i32 = arith.constant 0 : i32
    %c0_i32_0 = arith.constant 0 : i32
    %c0_i32_1 = arith.constant 0 : i32
    return %c0_i32, %c0_i32_0 : i32, i32
  }
  func.func @transform_5(%arg0: i32) -> (i32, i32) {
    %c0_i32 = arith.constant 0 : i32
    %c0_i32_0 = arith.constant 0 : i32
    %c0_i32_1 = arith.constant 0 : i32
    return %c0_i32, %c0_i32_0 : i32, i32
  }
  func.func @transform_6(%arg0: i32) -> (i32, i32) {
    %c0_i32 = arith.constant 0 : i32
    %c0_i32_0 = arith.constant 0 : i32
    %c0_i32_1 = arith.constant 0 : i32
    return %c0_i32, %c0_i32_0 : i32, i32
  }
  func.func @transform_7(%arg0: i32) -> (i32, i32) {
    %c0_i32 = arith.constant 0 : i32
    %c0_i32_0 = arith.constant 0 : i32
    %c0_i32_1 = arith.constant 0 : i32
    return %c0_i32, %c0_i32_0 : i32, i32
  }
  func.func @transform_8(%arg0: i32) -> (i32, i32) {
    %c0_i32 = arith.constant 0 : i32
    %c0_i32_0 = arith.constant 0 : i32
    %c0_i32_1 = arith.constant 0 : i32
    return %c0_i32, %c0_i32_0 : i32, i32
  }
  func.func @transform_9(%arg0: i32) -> (i32, i32) {
    %c0_i32 = arith.constant 0 : i32
    %c0_i32_0 = arith.constant 0 : i32
    %c0_i32_1 = arith.constant 0 : i32
    return %c0_i32, %c0_i32_0 : i32, i32
  }
  func.func @transform_10(%arg0: i32) -> (i32, i32) {
    %c0_i32 = arith.constant 0 : i32
    %c0_i32_0 = arith.constant 0 : i32
    %c0_i32_1 = arith.constant 0 : i32
    return %c0_i32, %c0_i32_0 : i32, i32
  }
  func.func @transform_11(%arg0: i32) -> (i32, i32) {
    %c0_i32 = arith.constant 0 : i32
    %c0_i32_0 = arith.constant 0 : i32
    %c0_i32_1 = arith.constant 0 : i32
    return %c0_i32, %c0_i32_0 : i32, i32
  }
  func.func @transform_12(%arg0: i32) -> (i32, i32) {
    %c0_i32 = arith.constant 0 : i32
    %c0_i32_0 = arith.constant 0 : i32
    %c0_i32_1 = arith.constant 0 : i32
    return %c0_i32, %c0_i32_0 : i32, i32
  }
  func.func @transform_13(%arg0: i32) -> (i32, i32) {
    %c0_i32 = arith.constant 0 : i32
    %c0_i32_0 = arith.constant 0 : i32
    return %arg0, %c0_i32 : i32, i32
  }
}

</mosaic_0001>

<bundles_post_ra>
// kernel: critic_forward.1
= control target key start
LH: loop header
LB: loop body
LE: loop exit
PB: predicated region body
PF: predicated region fallthrough
CT: control target
= control target key end

     0   :  { %v2527_v4 = vmov 0   ;;  %v245_v37 = vlaneseq  ;;  %v2528_v38 = vmov 1966171168   ;;  %vm1099_vm0 = vcmask 130048   ;;  %s3233_s0 = inlined_call_operand.vmem [shape: bf16[2,784], index: 0, kind: input, shape index: {}]   ;;  %s3234_s1 = inlined_call_operand.vmem [shape: f32[2,1], index: 1, kind: input, shape index: {}]   ;;  %s3235_s2 = inlined_call_operand.vmem [shape: bf16[784,288], index: 2, kind: input, shape index: {}]   ;;  %s3236_s3 = inlined_call_operand.vmem [shape: f32[1,288], index: 3, kind: input, shape index: {}]   ;;  %s3237_s4 = inlined_call_operand.vmem [shape: bf16[288,32], index: 4, kind: input, shape index: {}]   ;;  %s3238_s5 = inlined_call_operand.vmem [shape: f32[1,32], index: 5, kind: input, shape index: {}]   ;;  %s3239_s6 = inlined_call_operand.vmem [shape: bf16[32,64], index: 6, kind: input, shape index: {}]   ;;  %s3240_s7 = inlined_call_operand.vmem [shape: f32[1,64], index: 7, kind: input, shape index: {}]   ;;  %s3241_s8 = inlined_call_operand.vmem [shape: f32[1,64], index: 8, kind: input, shape index: {}]   ;;  %s3242_s9 = inlined_call_operand.vmem [shape: bf16[64,64], index: 9, kind: input, shape index: {}]   ;;  %s3243_s10 = inlined_call_operand.vmem [shape: f32[1,64], index: 10, kind: input, shape index: {}]   ;;  %s3244_s11 = inlined_call_operand.vmem [shape: bf16[64,5], index: 11, kind: input, shape index: {}]   ;;  %s3245_s12 = inlined_call_operand.vmem [shape: f32[1,5], index: 12, kind: input, shape index: {}]   ;;  %s3246_s13 = inlined_call_operand.hbm [shape: f32[2,5], index: 13, kind: output, shape index: {}]  }
   0x1   :  { %v2280_v0 = vld [vmem:[%s3235_s2 + $0xac] ss:$12 sps:$4 sm:$0xff]   ;;  %v2284_v2 = vld [vmem:[%s3235_s2 + $0xa8] ss:$12 sps:$4 sm:$0xff]   ;;  %2279 = vset.pattern.permute.xlu0 %v2527_v4  ;;  %v2290_v7 = vld [vmem:[%s3235_s2 + $0x90] ss:$12 sps:$4 sm:$0xff]   ;;  %v263_v39 = vunpack.c.l.s4 %v2528_v38 }
   0x2   :  { %v2282_v1 = vld [vmem:[%s3235_s2 + $0x22c] ss:$12 sps:$4 sm:$0xff]   ;;  %1103 = vmatprep.subr.bf16.mxu0 %v2280_v0  ;;  %v2285_v3 = vld [vmem:[%s3235_s2 + $0x228] ss:$12 sps:$4 sm:$0xff]   ;;  %v2291_v8 = vld [vmem:[%s3235_s2 + $0x210] ss:$12 sps:$4 sm:$0xff]  }
   0x3   :  { %1144 = vmatprep.subr.bf16.mxu1 %v2282_v1  ;;  %v2286_v5 = vld [vmem:[%s3235_s2 + $0x94] ss:$12 sps:$4 sm:$0xff]   ;;  %1104 = vmatpush1.bf16.msra.mxu0 %v2284_v2  ;;  %v2292_v9 = vld [vmem:[%s3235_s2 + $0x7c] ss:$12 sps:$4 sm:$0xff]   ;;  %v2296_v11 = vld [vmem:[%s3235_s2 + $0x78] ss:$12 sps:$4 sm:$0xff]   ;;  %v264_v44 = vunpack.c.0.s8 %v263_v39 }
   0x4   :  { %1145 = vmatpush1.bf16.msra.mxu1 %v2285_v3  ;;  %v2288_v6 = vld [vmem:[%s3235_s2 + $0x214] ss:$12 sps:$4 sm:$0xff]   ;;  %1105 = vmatprep.subr.bf16.mxu0 %v2286_v5  ;;  %v2294_v10 = vld [vmem:[%s3235_s2 + $0x1fc] ss:$12 sps:$4 sm:$0xff]   ;;  %v2297_v12 = vld [vmem:[%s3235_s2 + $0x1f8] ss:$12 sps:$4 sm:$0xff]  }
   0x5   :  { %1146 = vmatprep.subr.bf16.mxu1 %v2288_v6  ;;  %v2298_v13 = vld [vmem:[%s3235_s2 + $0x64] ss:$12 sps:$4 sm:$0xff]   ;;  %v2302_v15 = vld [vmem:[%s3235_s2 + $0x60] ss:$12 sps:$4 sm:$0xff]   ;;  %v2308_v19 = vld [vmem:[%s3235_s2 + $0x48] ss:$12 sps:$4 sm:$0xff]  }
   0x6   :  { %v2300_v14 = vld [vmem:[%s3235_s2 + $0x1e4] ss:$12 sps:$4 sm:$0xff]   ;;  %v2303_v16 = vld [vmem:[%s3235_s2 + $0x1e0] ss:$12 sps:$4 sm:$0xff]   ;;  %v2309_v20 = vld [vmem:[%s3235_s2 + $0x1c8] ss:$12 sps:$4 sm:$0xff]  }
   0x7   :  { %1106 = vmatpush1.bf16.msra.mxu0 %v2290_v7  ;;  %v2304_v17 = vld [vmem:[%s3235_s2 + $0x4c] ss:$12 sps:$4 sm:$0xff]   ;;  %v2310_v21 = vld [vmem:[%s3235_s2 + $0x34] ss:$12 sps:$4 sm:$0xff]   ;;  %v2314_v23 = vld [vmem:[%s3235_s2 + $0x30] ss:$12 sps:$4 sm:$0xff]  }
   0x8   :  { %1147 = vmatpush1.bf16.msra.mxu1 %v2291_v8  ;;  %1107 = vmatprep.subr.bf16.mxu0 %v2292_v9  ;;  %v2306_v18 = vld [vmem:[%s3235_s2 + $0x1cc] ss:$12 sps:$4 sm:$0xff]   ;;  %v2312_v22 = vld [vmem:[%s3235_s2 + $0x1b4] ss:$12 sps:$4 sm:$0xff]   ;;  %v2315_v24 = vld [vmem:[%s3235_s2 + $0x1b0] ss:$12 sps:$4 sm:$0xff]  }
   0x9   :  { %1148 = vmatprep.subr.bf16.mxu1 %v2294_v10  ;;  %v2316_v25 = vld [vmem:[%s3235_s2 + $0x1c] ss:$12 sps:$4 sm:$0xff]   ;;  %v2320_v27 = vld [vmem:[%s3235_s2 + $0x18] ss:$12 sps:$4 sm:$0xff]   ;;  %v2326_v31 = vld [vmem:[%s3235_s2] ss:$12 sps:$4 sm:$0xff]  }
   0xa   :  { %v2318_v26 = vld [vmem:[%s3235_s2 + $0x19c] ss:$12 sps:$4 sm:$0xff]   ;;  %v2321_v28 = vld [vmem:[%s3235_s2 + $0x198] ss:$12 sps:$4 sm:$0xff]   ;;  %v2327_v32 = vld [vmem:[%s3235_s2 + $0x180] ss:$12 sps:$4 sm:$0xff]  }
   0xb   :  { %1108 = vmatpush1.bf16.msra.mxu0 %v2296_v11  ;;  %v2322_v29 = vld [vmem:[%s3235_s2 + $0x4] ss:$12 sps:$4 sm:$0xff]   ;;  %v2328_v33 = vld [vmem:[%s3235_s2 + $0x16c] ss:$12 sps:$4 sm:$0xff]   ;;  %v2332_v35 = vld [vmem:[%s3235_s2 + $0x168] ss:$12 sps:$4 sm:$0xff]  }
   0xc   :  { %1149 = vmatpush1.bf16.msra.mxu1 %v2297_v12  ;;  %1109 = vmatprep.subr.bf16.mxu0 %v2298_v13  ;;  %v2324_v30 = vld [vmem:[%s3235_s2 + $0x184] ss:$12 sps:$4 sm:$0xff]   ;;  %v2330_v34 = vld [vmem:[%s3235_s2 + $0x2ec] ss:$12 sps:$4 sm:$0xff]   ;;  %v2333_v36 = vld [vmem:[%s3235_s2 + $0x2e8] ss:$12 sps:$4 sm:$0xff]  }
   0xd   :  { %1150 = vmatprep.subr.bf16.mxu1 %v2300_v14  ;;  %v2334_v40 = vld [vmem:[%s3235_s2 + $0x154] ss:$12 sps:$4 sm:$0xff]   ;;  %v2338_v42 = vld [vmem:[%s3235_s2 + $0x150] ss:$12 sps:$4 sm:$0xff]   ;;  %v2720_v43 = vshrl.u32 %v245_v37, 7 }
   0xe   :  { %v2336_v41 = vld [vmem:[%s3235_s2 + $0x2d4] ss:$12 sps:$4 sm:$0xff]   ;;  %v2339_v45 = vld [vmem:[%s3235_s2 + $0x2d0] ss:$12 sps:$4 sm:$0xff]   ;;  %v2344_v48 = vld [vmem:[%s3235_s2 + $0x138] ss:$12 sps:$4 sm:$0xff]  }
   0xf   :  { %1110 = vmatpush1.bf16.msra.mxu0 %v2302_v15  ;;  %v2340_v46 = vld [vmem:[%s3235_s2 + $0x13c] ss:$12 sps:$4 sm:$0xff]   ;;  %v2345_v49 = vld [vmem:[%s3235_s2 + $0x2b8] ss:$12 sps:$4 sm:$0xff]   ;;  %v2738_v50 = vsub.s32 %v264_v44, %v2720_v43  ;;  %v2350_v54 = vld [vmem:[%s3235_s2 + $0x120] ss:$12 sps:$4 sm:$0xff]  }
  0x10   :  { %1151 = vmatpush1.bf16.msra.mxu1 %v2303_v16  ;;  %1111 = vmatprep.subr.bf16.mxu0 %v2304_v17  ;;  %v2342_v47 = vld [vmem:[%s3235_s2 + $0x2bc] ss:$12 sps:$4 sm:$0xff]   ;;  %v2346_v51 = vld [vmem:[%s3235_s2 + $0x124] ss:$12 sps:$4 sm:$0xff]   ;;  %v2351_v56 = vld [vmem:[%s3235_s2 + $0x2a0] ss:$12 sps:$4 sm:$0xff]  }
  0x11   :  { %1152 = vmatprep.subr.bf16.mxu1 %v2306_v18  ;;  %v2348_v52 = vld [vmem:[%s3235_s2 + $0x2a4] ss:$12 sps:$4 sm:$0xff]   ;;  %v2352_v57 = vld [vmem:[%s3235_s2 + $0x10c] ss:$12 sps:$4 sm:$0xff]   ;;  %v2356_v60 = vld [vmem:[%s3235_s2 + $0x108] ss:$12 sps:$4 sm:$0xff]  }
  0x12   :  { %v46_v53 = vld [vmem:[%s3233_s0] sm:$0x7f]  ;;  %v2354_v58 = vld [vmem:[%s3235_s2 + $0x28c] ss:$12 sps:$4 sm:$0xff]   ;;  %v2357_v61 = vld [vmem:[%s3235_s2 + $0x288] ss:$12 sps:$4 sm:$0xff]  }
  0x13   :  { %1112 = vmatpush1.bf16.msra.mxu0 %v2308_v19  ;;  %v268_v55 = vrot.slane %v46_v53, %v2738_v50  ;;  %v2358_v63 = vld [vmem:[%s3235_s2 + $0xf4] ss:$12 sps:$4 sm:$0xff]   ;;  %v2362_v2 = vld [vmem:[%s3235_s2 + $0xf0] ss:$12 sps:$4 sm:$0xff]   ;;  %v2368_v7 = vld [vmem:[%s3235_s2 + $0xd8] ss:$12 sps:$4 sm:$0xff]   ;;  %v261_v10 = vcombine.high %v46_v53, %v46_v53 }
  0x14   :  { %1153 = vmatpush1.bf16.msra.mxu1 %v2309_v20  ;;  %1113 = vmatprep.subr.bf16.mxu0 %v2310_v21  ;;  %v2360_v0 = vld [vmem:[%s3235_s2 + $0x274] ss:$12 sps:$4 sm:$0xff]   ;;  %v2363_v3 = vld [vmem:[%s3235_s2 + $0x270] ss:$12 sps:$4 sm:$0xff]   ;;  %v2369_v8 = vld [vmem:[%s3235_s2 + $0x258] ss:$12 sps:$4 sm:$0xff]  }
  0x15   :  { %1154 = vmatprep.subr.bf16.mxu1 %v2312_v22  ;;  %v276_v59 = vcombine.high %v268_v55, %v268_v55  ;;  %v2364_v5 = vld [vmem:[%s3235_s2 + $0xdc] ss:$12 sps:$4 sm:$0xff]   ;;  %v2370_v9 = vld [vmem:[%s3235_s2 + $0xc4] ss:$12 sps:$4 sm:$0xff]   ;;  %v2374_v12 = vld [vmem:[%s3235_s2 + $0xc0] ss:$12 sps:$4 sm:$0xff]   ;;  %v2814_v14 = vrot.slane %v268_v55, %v2738_v50  ;;  %v275_v15 = vrot.slane %v261_v10, %v2738_v50 }
  0x16   :  { %v2366_v6 = vld [vmem:[%s3235_s2 + $0x25c] ss:$12 sps:$4 sm:$0xff]   ;;  %v2372_v11 = vld [vmem:[%s3235_s2 + $0x244] ss:$12 sps:$4 sm:$0xff]   ;;  %v2375_v13 = vld [vmem:[%s3235_s2 + $0x240] ss:$12 sps:$4 sm:$0xff]  }
  0x17   :  { %1114 = vmatpush1.bf16.msra.mxu0 %v2314_v23  ;;  %v2769_v62 = vrot.slane %v276_v59, %v2738_v50  ;;  %v2379_v16 = vld [vmem:[%s3235_s2 + $0x3ac] ss:$12 sps:$4 sm:$0xff]   ;;  %v2382_v17 = vld [vmem:[%s3235_s2 + $0x484] ss:$12 sps:$4 sm:$0xff]   ;;  %v277_v18 = vcombine.high %v275_v15, %v275_v15  ;;  %v2825_v19 = vcombine.high %v2814_v14, %v2814_v14  ;;  %v2377_v20 = vld [vmem:[%s3235_s2 + $0x3a8] ss:$12 sps:$4 sm:$0xff]  }
  0x18   :  { %1155 = vmatpush1.bf16.msra.mxu1 %v2315_v24  ;;  %1115 = vmatprep.subr.bf16.mxu0 %v2316_v25  ;;  %v2380_v21 = vld [vmem:[%s3235_s2 + $0x480] ss:$12 sps:$4 sm:$0xff]   ;;  %v2386_v23 = vld [vmem:[%s3235_s2 + $0x170] ss:$12 sps:$4 sm:$0xff]   ;;  %v2843_v25 = vrot.slane %v275_v15, %v2738_v50  ;;  %v2401_v38 = vld [vmem:[%s3235_s2 + $0x128] ss:$12 sps:$4 sm:$0xff]  }
  0x19   :  { %1156 = vmatprep.subr.bf16.mxu1 %v2318_v26  ;;  %v2779_v1 = vcombine.high %v2769_v62, %v2769_v62  ;;  %1135 = vmatprep.mubr.bf16.mxu0 %v2769_v62  ;;  %v2385_v22 = vld [vmem:[%s3235_s2 + $0x394] ss:$12 sps:$4 sm:$0xff]   ;;  %v2840_v24 = vrot.slane %v277_v18, %v2738_v50  ;;  %v2383_v26 = vld [vmem:[%s3235_s2 + $0x390] ss:$12 sps:$4 sm:$0xff]   ;;  %v2415_v50 = vld [vmem:[%s3235_s2 + $0x38] ss:$12 sps:$4 sm:$0xff]  }
  0x1a   :  { %v2400_v37 = vld [vmem:[%s3235_s2 + $0x80] ss:$12 sps:$4 sm:$0xff]   ;;  %v2409_v44 = vld [vmem:[%s3235_s2 + $0x31c] ss:$12 sps:$4 sm:$0xff]  }
  0x1b   :  { %1116 = vmatpush1.bf16.msra.mxu0 %v2320_v27  ;;  %1176 = vmatprep.mubr.bf16.mxu1 %v2779_v1  ;;  %v2389_v27 = vld [vmem:[%s3235_s2 + $0x37c] ss:$12 sps:$4 sm:$0xff]   ;;  %v2404_v39 = vld [vmem:[%s3235_s2 + $0x334] ss:$12 sps:$4 sm:$0xff]  }
  0x1c   :  { %1157 = vmatpush1.bf16.msra.mxu1 %v2321_v28  ;;  %1117 = vmatprep.subr.bf16.mxu0 %v2322_v29  ;;  %v2387_v28 = vld [vmem:[%s3235_s2 + $0x378] ss:$12 sps:$4 sm:$0xff]   ;;  %v2860_v29 = vcombine.high %v2843_v25, %v2843_v25  ;;  %v2417_v53 = vld [vmem:[%s3235_s2 + $0x468] ss:$12 sps:$4 sm:$0xff]   ;;  %v2426_v59 = vld [vmem:[%s3235_s2 + $0x2f0] ss:$12 sps:$4 sm:$0xff]  }
  0x1d   :  { %1158 = vmatprep.subr.bf16.mxu1 %v2324_v30  ;;  %v2391_v30 = vld [vmem:[%s3235_s2 + $0x158] ss:$12 sps:$4 sm:$0xff]   ;;  %v2421_v55 = vld [vmem:[%s3235_s2 + $0xc8] ss:$12 sps:$4 sm:$0xff]   ;;  %v2450_v15 = vld [vmem:[%s3235_s2 + $0x1d0] ss:$12 sps:$4 sm:$0xff]  }
  0x1e   :  { %v2444_v10 = vld [vmem:[%s3235_s2 + $0x3f4] ss:$12 sps:$4 sm:$0xff]  }
  0x1f   :  { %1118 = vmatpush1.bf16.msra.mxu0 %v2326_v31  ;;  %v2394_v31 = vld [vmem:[%s3235_s2 + $0x364] ss:$12 sps:$4 sm:$0xff]   ;;  %v2452_v18 = vld [vmem:[%s3235_s2 + $0x3c0] ss:$12 sps:$4 sm:$0xff]  }
  0x20   :  { %1159 = vmatpush1.bf16.msra.mxu1 %v2327_v32  ;;  %1119 = vmatprep.subr.bf16.mxu0 %v2328_v33  ;;  %v2392_v32 = vld [vmem:[%s3235_s2 + $0x360] ss:$12 sps:$4 sm:$0xff]   ;;  %v2395_v33 = vld [vmem:[%s3235_s2 + $0x98] ss:$12 sps:$4 sm:$0xff]  }
  0x21   :  { %1160 = vmatprep.subr.bf16.mxu1 %v2330_v34  ;;  %v2396_v34 = vld [vmem:[%s3235_s2 + $0x140] ss:$12 sps:$4 sm:$0xff]  }
  0x23   :  { %1120 = vmatpush2.bf16.msra.mxu0 %v2332_v35  ;;  %v2399_v35 = vld [vmem:[%s3235_s2 + $0x34c] ss:$12 sps:$4 sm:$0xff]  }
  0x24   :  { %1161 = vmatpush2.bf16.msra.mxu1 %v2333_v36  ;;  %1121 = vmatprep.subr.bf16.mxu0 %v2334_v40  ;;  %v2397_v36 = vld [vmem:[%s3235_s2 + $0x348] ss:$12 sps:$4 sm:$0xff]   ;;  %v2402_v40 = vld [vmem:[%s3235_s2 + $0x330] ss:$12 sps:$4 sm:$0xff]  }
  0x25   :  { %1162 = vmatprep.subr.bf16.mxu1 %v2336_v41  ;;  %v2405_v41 = vld [vmem:[%s3235_s2 + $0x68] ss:$12 sps:$4 sm:$0xff]  }
  0x27   :  { %1122 = vmatpush2.bf16.msra.mxu0 %v2338_v42  ;;  %v2406_v42 = vld [vmem:[%s3235_s2 + $0x110] ss:$12 sps:$4 sm:$0xff]  }
  0x28   :  { %1163 = vmatpush2.bf16.msra.mxu1 %v2339_v45  ;;  %1123 = vmatprep.subr.bf16.mxu0 %v2340_v46  ;;  %v2407_v45 = vld [vmem:[%s3235_s2 + $0x318] ss:$12 sps:$4 sm:$0xff]   ;;  %v2410_v46 = vld [vmem:[%s3235_s2 + $0x50] ss:$12 sps:$4 sm:$0xff]  }
  0x29   :  { %1164 = vmatprep.subr.bf16.mxu1 %v2342_v47  ;;  %v2411_v47 = vld [vmem:[%s3235_s2 + $0xf8] ss:$12 sps:$4 sm:$0xff]  }
  0x2b   :  { %1124 = vmatpush2.bf16.msra.mxu0 %v2344_v48  ;;  %v2414_v48 = vld [vmem:[%s3235_s2 + $0x304] ss:$12 sps:$4 sm:$0xff]  }
  0x2c   :  { %1165 = vmatpush2.bf16.msra.mxu1 %v2345_v49  ;;  %1125 = vmatprep.subr.bf16.mxu0 %v2346_v51  ;;  %v2412_v49 = vld [vmem:[%s3235_s2 + $0x300] ss:$12 sps:$4 sm:$0xff]  }
  0x2d   :  { %1166 = vmatprep.subr.bf16.mxu1 %v2348_v52  ;;  %v2416_v51 = vld [vmem:[%s3235_s2 + $0xe0] ss:$12 sps:$4 sm:$0xff]  }
  0x2e   :  { %v2419_v52 = vld [vmem:[%s3235_s2 + $0x46c] ss:$12 sps:$4 sm:$0xff]  }
  0x2f   :  { %1126 = vmatpush2.bf16.msra.mxu0 %v2350_v54  ;;  %v2420_v54 = vld [vmem:[%s3235_s2 + $0x20] ss:$12 sps:$4 sm:$0xff]  }
  0x30   :  { %1167 = vmatpush2.bf16.msra.mxu1 %v2351_v56  ;;  %1127 = vmatprep.subr.bf16.mxu0 %v2352_v57  ;;  %v2424_v56 = vld [vmem:[%s3235_s2 + $0x454] ss:$12 sps:$4 sm:$0xff]   ;;  %v2422_v57 = vld [vmem:[%s3235_s2 + $0x450] ss:$12 sps:$4 sm:$0xff]  }
  0x31   :  { %1168 = vmatprep.subr.bf16.mxu1 %v2354_v58  ;;  %v2425_v58 = vld [vmem:[%s3235_s2 + $0x8] ss:$12 sps:$4 sm:$0xff]  }
  0x33   :  { %1128 = vmatpush2.bf16.msra.mxu0 %v2356_v60  ;;  %v2429_v60 = vld [vmem:[%s3235_s2 + $0x43c] ss:$12 sps:$4 sm:$0xff]  }
  0x34   :  { %1169 = vmatpush2.bf16.msra.mxu1 %v2357_v61  ;;  %1129 = vmatprep.subr.bf16.mxu0 %v2358_v63  ;;  %v2427_v61 = vld [vmem:[%s3235_s2 + $0x438] ss:$12 sps:$4 sm:$0xff]  }
  0x35   :  { %1170 = vmatprep.subr.bf16.mxu1 %v2360_v0  ;;  %v2431_v63 = vld [vmem:[%s3235_s2 + $0x2d8] ss:$12 sps:$4 sm:$0xff]  }
  0x36   :  { %v2434_v0 = vld [vmem:[%s3235_s2 + $0x424] ss:$12 sps:$4 sm:$0xff]  }
  0x37   :  { %1130 = vmatpush2.bf16.msra.mxu0 %v2362_v2  ;;  %v2432_v2 = vld [vmem:[%s3235_s2 + $0x420] ss:$12 sps:$4 sm:$0xff]  }
  0x38   :  { %1171 = vmatpush2.bf16.msra.mxu1 %v2363_v3  ;;  %1131 = vmatprep.subr.bf16.mxu0 %v2364_v5  ;;  %v2435_v3 = vld [vmem:[%s3235_s2 + $0x218] ss:$12 sps:$4 sm:$0xff]   ;;  %v2436_v5 = vld [vmem:[%s3235_s2 + $0x2c0] ss:$12 sps:$4 sm:$0xff]  }
  0x39   :  { %1172 = vmatprep.subr.bf16.mxu1 %v2366_v6  ;;  %v2439_v6 = vld [vmem:[%s3235_s2 + $0x40c] ss:$12 sps:$4 sm:$0xff]  }
  0x3b   :  { %1132 = vmatpush2.bf16.msra.mxu0 %v2368_v7  ;;  %v2437_v7 = vld [vmem:[%s3235_s2 + $0x408] ss:$12 sps:$4 sm:$0xff]  }
  0x3c   :  { %1173 = vmatpush2.bf16.msra.mxu1 %v2369_v8  ;;  %1133 = vmatprep.subr.bf16.mxu0 %v2370_v9  ;;  %v2440_v8 = vld [vmem:[%s3235_s2 + $0x200] ss:$12 sps:$4 sm:$0xff]   ;;  %v2441_v9 = vld [vmem:[%s3235_s2 + $0x2a8] ss:$12 sps:$4 sm:$0xff]  }
  0x3d   :  { %1174 = vmatprep.subr.bf16.mxu1 %v2372_v11  ;;  %v2445_v11 = vld [vmem:[%s3235_s2 + $0x1e8] ss:$12 sps:$4 sm:$0xff]  }
  0x3f   :  { %1134 = vmatpush2.bf16.msra.mxu0 %v2374_v12  ;;  %v2446_v12 = vld [vmem:[%s3235_s2 + $0x290] ss:$12 sps:$4 sm:$0xff]  }
  0x40   :  { %1175 = vmatpush2.bf16.msra.mxu1 %v2375_v13  ;;  %1185 = vmatprep.subr.bf16.mxu0 %v2379_v16  ;;  %v2449_v13 = vld [vmem:[%s3235_s2 + $0x3dc] ss:$12 sps:$4 sm:$0xff]   ;;  %v2451_v16 = vld [vmem:[%s3235_s2 + $0x278] ss:$12 sps:$4 sm:$0xff]  }
  0x41   :  { %1240 = vmatprep.subr.bf16.mxu1 %v2382_v17  ;;  %v2454_v17 = vld [vmem:[%s3235_s2 + $0x3c4] ss:$12 sps:$4 sm:$0xff]  }
  0x42   :  { %1136 = vmatmul.mubr.bf16.vlgmr.msra.gmra.mxu0 %v2814_v14 }
  0x43   :  { %1177 = vmatmul.mubr.bf16.vlgmr.msra.gmra.mxu1 %v2825_v19  ;;  %1186 = vmatpush1.bf16.msra.mxu0 %v2377_v20  ;;  %v2455_v20 = vld [vmem:[%s3235_s2 + $0x1b8] ss:$12 sps:$4 sm:$0xff]  }
  0x44   :  { %1241 = vmatpush1.bf16.msra.mxu1 %v2380_v21  ;;  %1187 = vmatprep.subr.bf16.mxu0 %v2385_v22  ;;  %v2456_v21 = vld [vmem:[%s3235_s2 + $0x260] ss:$12 sps:$4 sm:$0xff]   ;;  %v2458_v22 = vld [vmem:[%s3235_s2 + $0x470] ss:$12 sps:$4 sm:$0xff]  }
  0x45   :  { %1258 = vmatprep.mubr.bf16.mxu1 %v2527_v4  ;;  %2122 = vmatprep.subr.bf16.mxu1 %v2386_v23  ;;  %v2390_v4 = vld [vmem:[%s3235_s2 + $0xb0] ss:$12 sps:$4 sm:$0xff]   ;;  %v2457_v23 = vld [vmem:[%s3235_s2 + $0x1a0] ss:$12 sps:$4 sm:$0xff]  }
  0x46   :  { %1217 = vmatprep.mubr.bf16.mxu0 %v2840_v24 }
  0x47   :  { %1188 = vmatpush1.bf16.msra.mxu0 %v2383_v26  ;;  %v2459_v26 = vld [vmem:[%s3235_s2 + $0x3b0] ss:$12 sps:$4 sm:$0xff]  }
  0x48   :  { %1189 = vmatprep.subr.bf16.mxu0 %v2389_v27  ;;  %v2460_v27 = vld [vmem:[%s3235_s2 + $0x248] ss:$12 sps:$4 sm:$0xff]  }
  0x4b   :  { %2083 = vmatmul.mubr.msk.bf16.vlgmr.msra.gmra.mxu1 %vm1099_vm0, %v2860_v29  ;;  %1190 = vmatpush1.bf16.msra.mxu0 %v2387_v28  ;;  %v2462_v28 = vld [vmem:[%s3235_s2 + $0x458] ss:$12 sps:$4 sm:$0xff]  }
  0x4c   :  { %2123 = vmatpush3.bf16.msra.mxu1 %v2390_v4  ;;  %1191 = vmatprep.subr.bf16.mxu0 %v2394_v31  ;;  %v2461_v4 = vld [vmem:[%s3235_s2 + $0x188] ss:$12 sps:$4 sm:$0xff]   ;;  %v2464_v31 = vld [vmem:[%s3235_s2 + $0x440] ss:$12 sps:$4 sm:$0xff]  }
  0x4d   :  { %2124 = vmatprep.subr.bf16.mxu1 %v2391_v30  ;;  %1299 = vmatprep.mubr.bf16.mxu1 %v2769_v62  ;;  %v2430_v62 = vld [vmem:[%s3235_s2 + $0x230] ss:$12 sps:$4 sm:$0xff]   ;;  %v2463_v30 = vld [vmem:[%s3235_s2 + $0x398] ss:$12 sps:$4 sm:$0xff]  }
  0x4f   :  { %1192 = vmatpush1.bf16.msra.mxu0 %v2392_v32 }
  0x50   :  { %2125 = vmatpush3.bf16.msra.mxu1 %v2395_v33  ;;  %1193 = vmatprep.subr.bf16.mxu0 %v2399_v35 }
  0x51   :  { %2126 = vmatprep.subr.bf16.mxu1 %v2396_v34 }
  0x53   :  { %1194 = vmatpush1.bf16.msra.mxu0 %v2397_v36 }
  0x54   :  { %2127 = vmatpush3.bf16.msra.mxu1 %v2400_v37  ;;  %1195 = vmatprep.subr.bf16.mxu0 %v2404_v39 }
  0x55   :  { %2128 = vmatprep.subr.bf16.mxu1 %v2401_v38 }
  0x57   :  { %1196 = vmatpush1.bf16.msra.mxu0 %v2402_v40 }
  0x58   :  { %2129 = vmatpush3.bf16.msra.mxu1 %v2405_v41  ;;  %1197 = vmatprep.subr.bf16.mxu0 %v2409_v44 }
  0x59   :  { %2130 = vmatprep.subr.bf16.mxu1 %v2406_v42 }
  0x5b   :  { %1198 = vmatpush1.bf16.msra.mxu0 %v2407_v45 }
  0x5c   :  { %2131 = vmatpush3.bf16.msra.mxu1 %v2410_v46  ;;  %1199 = vmatprep.subr.bf16.mxu0 %v2414_v48 }
  0x5d   :  { %2132 = vmatprep.subr.bf16.mxu1 %v2411_v47 }
  0x5f   :  { %1200 = vmatpush1.bf16.msra.mxu0 %v2412_v49 }
  0x60   :  { %2133 = vmatpush3.bf16.msra.mxu1 %v2415_v50  ;;  %1201 = vmatprep.subr.bf16.mxu0 %v2419_v52 }
  0x61   :  { %2134 = vmatprep.subr.bf16.mxu1 %v2416_v51 }
  0x63   :  { %1202 = vmatpush2.bf16.msra.mxu0 %v2417_v53 }
  0x64   :  { %2135 = vmatpush3.bf16.msra.mxu1 %v2420_v54  ;;  %1203 = vmatprep.subr.bf16.mxu0 %v2424_v56 }
  0x65   :  { %2136 = vmatprep.subr.bf16.mxu1 %v2421_v55 }
  0x67   :  { %1204 = vmatpush2.bf16.msra.mxu0 %v2422_v57 }
  0x68   :  { %2137 = vmatpush3.bf16.msra.mxu1 %v2425_v58  ;;  %1205 = vmatprep.subr.bf16.mxu0 %v2429_v60 }
  0x69   :  { %2144 = vmatprep.subr.bf16.mxu1 %v2426_v59 }
  0x6b   :  { %1300 = vmatmul.mubr.bf16.vlgmr.msra.gmra.mxu1 %v2814_v14  ;;  %1206 = vmatpush2.bf16.msra.mxu0 %v2427_v61  ;;  %v2447_v14 = vld [vmem:[%s3235_s2 + $0x3d8] ss:$12 sps:$4 sm:$0xff]  }
  0x6c   :  { %2145 = vmatpush3.bf16.msra.mxu1 %v2430_v62  ;;  %1207 = vmatprep.subr.bf16.mxu0 %v2434_v0 }
  0x6d   :  { %2146 = vmatprep.subr.bf16.mxu1 %v2431_v63  ;;  %1339 = vmatprep.mubr.bf16.mxu1 %v2779_v1  ;;  %v2442_v1 = vld [vmem:[%s3235_s2 + $0x3f0] ss:$12 sps:$4 sm:$0xff]  }
  0x6f   :  { %1208 = vmatpush2.bf16.msra.mxu0 %v2432_v2 }
  0x70   :  { %2147 = vmatpush3.bf16.msra.mxu1 %v2435_v3  ;;  %1209 = vmatprep.subr.bf16.mxu0 %v2439_v6 }
  0x71   :  { %2148 = vmatprep.subr.bf16.mxu1 %v2436_v5 }
  0x73   :  { %1210 = vmatpush2.bf16.msra.mxu0 %v2437_v7 }
  0x74   :  { %2149 = vmatpush3.bf16.msra.mxu1 %v2440_v8  ;;  %1211 = vmatprep.subr.bf16.mxu0 %v2444_v10 }
  0x75   :  { %2150 = vmatprep.subr.bf16.mxu1 %v2441_v9 }
  0x77   :  { %1212 = vmatpush2.bf16.msra.mxu0 %v2442_v1 }
  0x78   :  { %2151 = vmatpush3.bf16.msra.mxu1 %v2445_v11  ;;  %1213 = vmatprep.subr.bf16.mxu0 %v2449_v13 }
  0x79   :  { %2152 = vmatprep.subr.bf16.mxu1 %v2446_v12 }
  0x7b   :  { %1214 = vmatpush2.bf16.msra.mxu0 %v2447_v14 }
  0x7c   :  { %2153 = vmatpush3.bf16.msra.mxu1 %v2450_v15  ;;  %1215 = vmatprep.subr.bf16.mxu0 %v2454_v17 }
  0x7d   :  { %2154 = vmatprep.subr.bf16.mxu1 %v2451_v16 }
  0x7f   :  { %1216 = vmatpush2.bf16.msra.mxu0 %v2452_v18 }
  0x80   :  { %2155 = vmatpush3.bf16.msra.mxu1 %v2455_v20  ;;  %2166 = vmatprep.subr.bf16.mxu0 %v2458_v22 }
  0x81   :  { %2156 = vmatprep.subr.bf16.mxu1 %v2456_v21 }
  0x82   :  { %1218 = vmatmul.mubr.bf16.vlgmr.msra.gmra.mxu0 %v2843_v25 }
  0x83   :  { %2167 = vmatpush3.bf16.msra.mxu0 %v2459_v26  ;;  %1379 = vmatprep.mubr.bf16.mxu0 %v2840_v24 }
  0x84   :  { %2157 = vmatpush3.bf16.msra.mxu1 %v2457_v23  ;;  %2168 = vmatprep.subr.bf16.mxu0 %v2462_v28 }
  0x85   :  { %2158 = vmatprep.subr.bf16.mxu1 %v2460_v27 }
  0x86   :  { %18 = vsyncpa [#allocation3], 0  ;;  %v2465_v32 = vld [vmem:[%s3235_s2 + $0x380] ss:$12 sps:$4 sm:$0xff]   ;;  %v2476_v33 = vld [vmem:[%s3235_s2 + $0x488] ss:$12 sps:$4 sm:$0xff]  }
  0x87   :  { %2169 = vmatpush3.bf16.msra.mxu0 %v2463_v30  ;;  %v2466_v34 = vld [vmem:[%s3235_s2 + $0x428] ss:$12 sps:$4 sm:$0xff]   ;;  %v2529_v35 = vmov 0.0   ;;  %v2468_v36 = vld [vmem:[%s3235_s2 + $0x410] ss:$12 sps:$4 sm:$0xff]   ;;  %vm2530_vm1 = vmmov 0  }
  0x88   :  { %2159 = vmatpush3.bf16.msra.mxu1 %v2461_v4  ;;  %2170 = vmatprep.subr.bf16.mxu0 %v2464_v31  ;;  %v2467_v24 = vld [vmem:[%s3235_s2 + $0x368] ss:$12 sps:$4 sm:$0xff]   ;;  %v2470_v37 = vld [vmem:[%s3235_s2 + $0x3f8] ss:$12 sps:$4 sm:$0xff]   ;;  %v2472_v44 = vld [vmem:[%s3235_s2 + $0x3e0] ss:$12 sps:$4 sm:$0xff]  }
  0x89   :  { %2228 = vmatprep.subr.bf16.mxu1 %v2529_v35  ;;  %v2477_v38 = vld [vmem:[%s3237_s4 + $0x78] sm:$0xff]   ;;  %v2479_v40 = vld [vmem:[%s3237_s4 + $0x70] sm:$0xff]   ;;  %v2473_v45 = vld [vmem:[%s3235_s2 + $0x320] ss:$12 sps:$4 sm:$0xff]   ;;  %v247_v13 = vsub.s32 0, %v2720_v43  ;;  %v251_v15 = vsub.s32 1, %v2720_v43 }
  0x8a   :  { %v2478_v39 = vld [vmem:[%s3237_s4 + $0x38] sm:$0xff]   ;;  %v2480_v42 = vld [vmem:[%s3237_s4 + $0x30] sm:$0xff]   ;;  %v2482_v46 = vld [vmem:[%s3237_s4 + $0x28] sm:$0xff]   ;;  %vm1584_vm2 = vcmask 261120   ;;  %vm1792_vm3 = vcmask 523264   ;;  %s2531_s0 = smov [#allocation2]  }
  0x8b   :  { %1340 = vmatmul.mubr.bf16.vlgmr.msra.gmra.mxu1 %v2825_v19  ;;  %2171 = vmatpush3.bf16.msra.mxu0 %v2465_v32  ;;  %v2469_v19 = vld [vmem:[%s3235_s2 + $0x350] ss:$12 sps:$4 sm:$0xff]   ;;  %v2471_v41 = vld [vmem:[%s3235_s2 + $0x338] ss:$12 sps:$4 sm:$0xff]   ;;  %v2474_v47 = vld [vmem:[%s3235_s2 + $0x3c8] ss:$12 sps:$4 sm:$0xff]  }
  0x8c   :  { %2229 = vmatpush3.bf16.msra.mxu1 %v2476_v33  ;;  %2172 = vmatprep.subr.bf16.mxu0 %v2466_v34  ;;  %v2475_v48 = vld [vmem:[%s3235_s2 + $0x308] ss:$12 sps:$4 sm:$0xff]   ;;  %v2483_v49 = vld [vmem:[%s3237_s4 + $0x60] sm:$0xff]   ;;  %v2485_v51 = vld [vmem:[%s3237_s4 + $0x58] sm:$0xff]   ;;  %vm1920_vm4 = vcmask 33792  }
  0x8d   :  { %2230 = vmatprep.mubr.msk.bf16.mxu1 %vm2530_vm1, %v2529_v35  ;;  %2190 = vmatprep.subr.bf16.mxu1 %v2477_v38  ;;  %v2484_v50 = vld [vmem:[%s3237_s4 + $0x20] sm:$0xff]   ;;  %v2487_v52 = vld [vmem:[%s3237_s4 + $0x50] sm:$0xff]   ;;  %v2489_v54 = vld [vmem:[%s3237_s4 + $0x48] sm:$0xff]  }
  0x8e   :  { %v2488_v53 = vld [vmem:[%s3237_s4 + $0x10] sm:$0xff]   ;;  %v2490_v55 = vld [vmem:[%s3237_s4 + $0x8] sm:$0xff]   ;;  %v2491_v56 = vld [vmem:[%s3237_s4 + $0x40] sm:$0xff]  }
  0x8f   :  { %2173 = vmatpush3.bf16.msra.mxu0 %v2467_v24  ;;  %v2492_v57 = vld [vmem:[%s3237_s4] sm:$0xff]   ;;  %v2493_v58 = vld [vmem:[%s3237_s4 + $0x88] sm:$0xff]  }
  0x90   :  { %2174 = vmatprep.subr.bf16.mxu0 %v2468_v36  ;;  %v2494_v59 = vld [vmem:[%s3237_s4 + $0x80] sm:$0xff]  }
  0x91   :  { %v243_v14 = vld [vmem:[%s3236_s3] sm:$0x7] }
  0x92   :  { %v248_v16 = vrot.slane %v243_v14, %v247_v13  ;;  %v252_v17 = vrot.slane %v243_v14, %v251_v15  ;;  %v2499_v13 = vld [vmem:[%s3242_s9 + $0x8] sm:$0xff]   ;;  %v2501_v15 = vld [vmem:[%s3244_s11 + $0x18] sm:$0xff]  }
  0x93   :  { %2231 = vmatmul.mubr.msk.bf16.vlgmr.msra.gmra.mxu1 %vm1099_vm0, %v2860_v29  ;;  %2175 = vmatpush3.bf16.msra.mxu0 %v2469_v19  ;;  %v2481_v29 = vld [vmem:[%s3237_s4 + $0x68] sm:$0xff]  }
  0x94   :  { %2191 = vmatpush3.bf16.msra.mxu1 %v2478_v39  ;;  %2176 = vmatprep.subr.bf16.mxu0 %v2470_v37 }
  0x95   :  { %2192 = vmatprep.subr.bf16.mxu1 %v2479_v40 }
  0x97   :  { %2177 = vmatpush3.bf16.msra.mxu0 %v2471_v41 }
  0x98   :  { %2193 = vmatpush3.bf16.msra.mxu1 %v2480_v42  ;;  %2178 = vmatprep.subr.bf16.mxu0 %v2472_v44 }
  0x99   :  { %2194 = vmatprep.subr.bf16.mxu1 %v2481_v29  ;;  %v255_v29 = vsub.s32 2, %v2720_v43  ;;  %v2495_v43 = vld [vmem:[%s3239_s6 + $0x8] sm:$0xff]  }
  0x9b   :  { %2179 = vmatpush3.bf16.msra.mxu0 %v2473_v45  ;;  %v256_v45 = vrot.slane %v243_v14, %v255_v29  ;;  %v2500_v14 = vld [vmem:[%s3242_s9] sm:$0xff]  }
  0x9c   :  { %2195 = vmatpush3.bf16.msra.mxu1 %v2482_v46  ;;  %2180 = vmatprep.subr.bf16.mxu0 %v2474_v47 }
  0x9d   :  { %2196 = vmatprep.subr.bf16.mxu1 %v2483_v49 }
  0x9f   :  { %2181 = vmatpush3.bf16.msra.mxu0 %v2475_v48 }
  0xa0   :  { %2234 = vmatprep.subr.bf16.mxu0 %v2529_v35  ;;  %2197 = vmatpush3.bf16.msra.mxu1 %v2484_v50 }
  0xa1   :  { %2198 = vmatprep.subr.bf16.mxu1 %v2485_v51 }
  0xa2   :  { %1380 = vmatmul.mubr.bf16.vlgmr.msra.gmra.mxu0 %v2843_v25  ;;  %v2486_v25 = vld [vmem:[%s3237_s4 + $0x18] sm:$0xff]  }
  0xa3   :  { %2238 = vmatprep.mubr.msk.bf16.mxu0 %vm2530_vm1, %v2529_v35  ;;  %2235 = vmatpush3.bf16.msra.mxu0 %v2493_v58  ;;  %v2496_v58 = vld [vmem:[%s3239_s6] sm:$0xff]  }
  0xa4   :  { %2199 = vmatpush3.bf16.msra.mxu1 %v2486_v25  ;;  %2236 = vmatprep.subr.bf16.mxu0 %v2529_v35 }
  0xa5   :  { %2200 = vmatprep.subr.bf16.mxu1 %v2487_v52 }
  0xa7   :  { %2237 = vmatpush3.bf16.msra.mxu0 %v2494_v59  ;;  %v1674_v59 = vld [vmem:[%s3234_s1] sm:$0x3] }
  0xa8   :  { %2201 = vmatpush3.bf16.msra.mxu1 %v2488_v53  ;;  %2242 = vmatprep.subr.bf16.mxu0 %v2529_v35 }
  0xa9   :  { %2202 = vmatprep.subr.bf16.mxu1 %v2489_v54  ;;  %1678 = vperm.xlu0 %2279, %v1674_v59  }
  0xac   :  { %2203 = vmatpush3.bf16.msra.mxu1 %v2490_v55 }
  0xad   :  { %2204 = vmatprep.subr.bf16.mxu1 %v2491_v56 }
  0xb0   :  { %2205 = vmatpush3.bf16.msra.mxu1 %v2492_v57 }
  0xb1   :  { %2262 = vmatprep.subr.bf16.mxu1 %v2529_v35 }
 0x102   :  { %v1137_v60 = vpop.f32.mrf.mxu0 }
 0x103   :  { %v1178_v61 = vpop.f32.mrf.mxu1  ;;  %v1138_v18 = vadd.f32 %v1137_v60, %v248_v16  ;;  %v2502_v16 = vld [vmem:[%s3244_s11 + $0x10] sm:$0xff]  }
 0x104   :  { %v1139_v62 = vpop.f32.mrf.mxu0 }
 0x105   :  { %v1180_v63 = vpop.f32.mrf.mxu1  ;;  %v1140_v20 = vadd.f32 %v1139_v62, %v252_v17  ;;  %v1179_v21 = vadd.f32 %v1178_v61, %v1138_v18  ;;  %v2105_v17 = vld [vmem:[%s3240_s7] ss:$0 sm:$0xff] }
 0x106   :  { %v1141_v0 = vpop.f32.mrf.mxu0 }
 0x107   :  { %v1182_v2 = vpop.f32.mrf.mxu1  ;;  %v1181_v23 = vadd.f32 %v1180_v63, %v1140_v20 }
 0x108   :  { %v1142_v3 = vpop.f32.mrf.mxu0  ;;  %v2085_v2 = vld [vmem:[%s3238_s5] ss:$0 sm:$0xff] }
 0x109   :  { %v1183_v5 = vpop.f32.mrf.mxu1 }
 0x10b   :  { %v1260_v6 = vpop.f32.mrf.mxu1 }
 0x10d   :  { %v1262_v7 = vpop.f32.mrf.mxu1 }
 0x10f   :  { %v1264_v8 = vpop.f32.mrf.mxu1 }
 0x111   :  { %v1265_v9 = vpop.f32.mrf.mxu1 }
 0x124   :  { %v1679_v18 = vpop.permute.xlu0 %1678 }
 0x125   :  { %v1687_v20 = vmul.f32 %v2105_v17, %v1679_v18 }
 0x12b   :  { %v2138_v10 = vpop.f32.mrf.mxu1 }
 0x12d   :  { %v2139_v1 = vpop.f32.mrf.mxu1 }
 0x12e   :  { %v2140_v46 = vadd.f32 %v2139_v1, %v2138_v10  ;;  %v2497_v10 = vld [vmem:[%s3242_s9 + $0x18] sm:$0xff]  }
 0x12f   :  { %v2141_v11 = vpop.f32.mrf.mxu1 }
 0x130   :  { %v1302_v49 = vadd.f32 %v2140_v46, %v256_v45 }
 0x131   :  { %v2142_v12 = vpop.f32.mrf.mxu1 }
 0x132   :  { %v2498_v12 = vld [vmem:[%s3242_s9 + $0x10] sm:$0xff]  }
 0x142   :  { %v1219_v22 = vpop.f32.mrf.mxu0 }
 0x143   :  { %v1220_v26 = vadd.f32 %v1219_v22, %v1179_v21  ;;  %v2109_v22 = vld [vmem:[%s3241_s8] ss:$0 sm:$0xff] }
 0x144   :  { %v1221_v27 = vpop.f32.mrf.mxu0 }
 0x145   :  { %v1261_v28 = vadd.f32 %v1260_v6, %v1220_v26  ;;  %v1222_v4 = vadd.f32 %v1221_v27, %v1181_v23 }
 0x146   :  { %v1223_v30 = vpop.f32.mrf.mxu0 }
 0x147   :  { %v1263_v31 = vadd.f32 %v1262_v7, %v1222_v4  ;;  %v1427_v32 = vmax.f32 %v1261_v28, 0.0 }
 0x148   :  { %v1224_v33 = vpop.f32.mrf.mxu0 }
 0x149   :  { %v1428_v34 = vmax.f32 %v1263_v31, 0.0  ;;  %v1430_v19 = vpack.c.bf16 %v1427_v32, %v1427_v32  ;;  %v2503_v32 = vld [vmem:[%s3244_s11 + $0x8] sm:$0xff]   ;;  %v2504_v33 = vld [vmem:[%s3244_s11] sm:$0xff]   ;;  %s1928_s11 = sshll.u32 %s2531_s0, 4  ;;  %s1929_s11 = int_to_ptr.vmem [resolvable:$true] %s1928_s11 }
 0x14a   :  { %p2510_p1 = scmp.lt.s32.totalorder %s1929_s11, %s1929_s11 }
 0x14b   :  { %v2160_v24 = vpop.f32.mrf.mxu1  ;;  %v1431_v36 = vpack.c.bf16 %v1428_v34, %v1428_v34  ;;  %v2110_v34 = vld [vmem:[%s3243_s10] ss:$0 sm:$0xff]  ;;  %s2505_s10 = scalar_lea.vmem %s1929_s11, 32 }
 0x14c   :  { %p2506_p0 = scmp.ne.s32.totalorder %s1929_s11, %s2505_s10  ;;  %p2511_p2 = scmp.lt.s32.totalorder %s2505_s10, %s2505_s10 }
 0x14d   :  { %v2161_v37 = vpop.f32.mrf.mxu1  ;;  %1620 = vmatprep.mubr.bf16.mxu1 %v1431_v36 }
 0x14e   :  { %1621 = vmatmul.mubr.bf16.vlgmr.msra.gmra.mxu1 %v1430_v19  ;;  %v2162_v47 = vadd.f32 %v2161_v37, %v2160_v24  ;;  %p2512_p3 = por %p2511_p2, %p2510_p1 }
 0x14f   :  { %v2163_v38 = vpop.f32.mrf.mxu1  ;;  %2270 = vmatprep.mubr.msk.bf16.mxu1 %vm2530_vm1, %v2529_v35  ;;  %2263 = vmatpush3.bf16.msra.mxu1 %v2501_v15 }
 0x150   :  { %v1342_v51 = vadd.f32 %v2162_v47, %v1302_v49  ;;  %2264 = vmatprep.subr.bf16.mxu1 %v2529_v35  ;;  %p2513_p4 = pnand %p2512_p3, %p2506_p0 }
 0x151   :  { %v2164_v39 = vpop.f32.mrf.mxu1 }
 0x153   :  { %v1421_v40 = vpop.f32.mrf.mxu1  ;;  %2265 = vmatpush3.bf16.msra.mxu1 %v2502_v16 }
 0x154   :  { %2266 = vmatprep.subr.bf16.mxu1 %v2529_v35 }
 0x155   :  { %v2232_v41 = vpop.f32.mrf.mxu1 }
 0x157   :  { %v1424_v42 = vpop.f32.mrf.mxu1  ;;  %2267 = vmatpush3.bf16.msra.mxu1 %v2503_v32 }
 0x158   :  { %2268 = vmatprep.subr.bf16.mxu1 %v2529_v35 }
 0x159   :  { %v2233_v44 = vpop.f32.mrf.mxu1 }
 0x15b   :  { %2269 = vmatpush3.bf16.msra.mxu1 %v2504_v33 }
 0x162   :  { %v2182_v48 = vpop.f32.mrf.mxu0 }
 0x164   :  { %v2183_v50 = vpop.f32.mrf.mxu0 }
 0x165   :  { %v2184_v25 = vadd.f32 %v2183_v50, %v2182_v48 }
 0x166   :  { %v2185_v52 = vpop.f32.mrf.mxu0 }
 0x167   :  { %v1382_v53 = vadd.f32 %v2184_v25, %v1342_v51 }
 0x168   :  { %v2186_v54 = vpop.f32.mrf.mxu0 }
 0x169   :  { %v1422_v55 = vadd.f32 %v1421_v40, %v1382_v53 }
 0x16b   :  { %v1429_v56 = vmax.f32 %v1422_v55, 0.0 }
 0x16d   :  { %v1432_v57 = vpack.c.bf16 %v1429_v56, %v1429_v56 }
 0x16f   :  { %2239 = vmatmul.mubr.msk.bf16.vlgmr.msra.gmra.mxu0 %vm1584_vm2, %v1432_v57 }
 0x170   :  { %2246 = vmatprep.mubr.msk.bf16.mxu0 %vm2530_vm1, %v2529_v35  ;;  %2243 = vmatpush3.bf16.msra.mxu0 %v2495_v43 }
 0x171   :  { %2244 = vmatprep.subr.bf16.mxu0 %v2529_v35 }
 0x174   :  { %2245 = vmatpush3.bf16.msra.mxu0 %v2496_v58 }
 0x175   :  { %2250 = vmatprep.subr.bf16.mxu0 %v2529_v35 }
 0x20e   :  { %v2206_v60 = vpop.f32.mrf.mxu1 }
 0x210   :  { %v2207_v61 = vpop.f32.mrf.mxu1 }
 0x211   :  { %v2208_v0 = vadd.f32 %v2207_v61, %v2206_v60 }
 0x212   :  { %v2209_v62 = vpop.f32.mrf.mxu1 }
 0x213   :  { %v1623_v3 = vadd.f32 %v2208_v0, %v2085_v2 }
 0x214   :  { %v2210_v63 = vpop.f32.mrf.mxu1 }
 0x22f   :  { %v1662_v5 = vpop.f32.mrf.mxu0 }
 0x230   :  { %v1663_v6 = vadd.f32 %v1662_v5, %v1623_v3 }
 0x231   :  { %v2240_v7 = vpop.f32.mrf.mxu0 }
 0x232   :  { %v1668_v8 = vmax.f32 %v1663_v6, 0.0 }
 0x233   :  { %v1665_v9 = vpop.f32.mrf.mxu0 }
 0x234   :  { %v1669_v1 = vpack.c.bf16 %v1668_v8, %v1668_v8 }
 0x235   :  { %v2241_v11 = vpop.f32.mrf.mxu0 }
 0x236   :  { %2247 = vmatmul.mubr.msk.bf16.vlgmr.msra.gmra.mxu0 %vm1584_vm2, %v1669_v1 }
 0x237   :  { %2251 = vmatpush3.bf16.msra.mxu0 %v2497_v10  ;;  %2258 = vmatprep.mubr.msk.bf16.mxu0 %vm2530_vm1, %v2529_v35 }
 0x238   :  { %2252 = vmatprep.subr.bf16.mxu0 %v2529_v35 }
 0x23b   :  { %2253 = vmatpush3.bf16.msra.mxu0 %v2498_v12 }
 0x23c   :  { %2254 = vmatprep.subr.bf16.mxu0 %v2529_v35 }
 0x23f   :  { %2255 = vmatpush3.bf16.msra.mxu0 %v2499_v13 }
 0x240   :  { %2256 = vmatprep.subr.bf16.mxu0 %v2529_v35  ;;  %v2116_v35 = vld [vmem:[%s3245_s12] ss:$0 sm:$0xff] }
 0x243   :  { %2257 = vmatpush3.bf16.msra.mxu0 %v2500_v14 }
 0x2f6   :  { %v1737_v21 = vpop.f32.mrf.mxu0 }
 0x2f7   :  { %v1738_v23 = vadd.f32 %v1737_v21, %v1687_v20 }
 0x2f8   :  { %v2248_v26 = vpop.f32.mrf.mxu0 }
 0x2f9   :  { %v1750_v27 = vadd.f32 %v2109_v22, %v1738_v23 }
 0x2fa   :  { %v1740_v28 = vpop.f32.mrf.mxu0 }
 0x2fb   :  { %v1751_v4 = vmax.f32 %v1750_v27, 0.0 }
 0x2fc   :  { %v2249_v30 = vpop.f32.mrf.mxu0 }
 0x2fd   :  { %v1752_v31 = vpack.c.bf16 %v1751_v4, %v1751_v4 }
 0x2ff   :  { %2259 = vmatmul.mubr.msk.bf16.vlgmr.msra.gmra.mxu0 %vm1792_vm3, %v1752_v31 }
 0x3bf   :  { %v1830_v24 = vpop.f32.mrf.mxu0 }
 0x3c0   :  { %v1831_v36 = vadd.f32 %v2110_v34, %v1830_v24 }
 0x3c1   :  { %v2260_v19 = vpop.f32.mrf.mxu0 }
 0x3c2   :  { %v1836_v37 = vmax.f32 %v1831_v36, 0.0 }
 0x3c3   :  { %v1833_v38 = vpop.f32.mrf.mxu0 }
 0x3c4   :  { %v1837_v39 = vpack.c.bf16 %v1836_v37, %v1836_v37 }
 0x3c5   :  { %v2261_v40 = vpop.f32.mrf.mxu0 }
 0x3c6   :  { %2271 = vmatmul.mubr.msk.bf16.vlgmr.msra.gmra.mxu1 %vm1792_vm3, %v1837_v39 }
 0x486   :  { %v1914_v41 = vpop.f32.mrf.mxu1 }
 0x487   :  { %v1915_v42 = vadd.f32 %v2116_v35, %v1914_v41 }
 0x488   :  { %v2272_v44 = vpop.f32.mrf.mxu1 }
 0x489   :  { %1921 = vst.msk [vmem:[#allocation2] sm:$0x3] %vm1920_vm4, %v1915_v42 }
 0x48a   :  { %v1917_v29 = vpop.f32.mrf.mxu1 }
 0x48b   :  { %2516 = shalt.err (!%p2513_p4)
}
 0x48c   :  { %1931 = dma.vmem_to_hbm [thread:$0]  %s1929_s11, 32, %s3246_s13, [#allocation3]   ;;  %v2273_v45 = vpop.f32.mrf.mxu1 }
 0x48d   :  { %2525 = dma.done.wait [#allocation3], 32  }
 0x48e   :  { %2526 = vsyncadd [#allocation3], 4294967264 }
 0x48f   :  { %1935 = vsyncpa [#allocation3], 1 }

</bundles_post_ra>
